<compile_context>
chip_gen: v7x
topology: tpu7x:2x2x1
jax: 0.10.0
libtpu: 0.0.40
codegen_flags: <defaults>
</compile_context>

<pallas_src>
import functools

import jax
import jax.numpy as jnp
from jax.experimental import pallas as pl
from jax.experimental.pallas import tpu as pltpu

# Widest-first lane-dim candidates (all multiples of 128).
_LANE_CANDIDATES = (4096, 2048, 1024, 512, 256, 128)

_SUPPORTED_ACTS = ("relu", "sigmoid", "tanh")


def _apply_act(x, act: str):
    """Elementwise activation (used both in-kernel and on the jnp fallback path)."""
    if act == "relu":
        return jnp.maximum(x, jnp.zeros_like(x))
    if act == "sigmoid":
        # sigmoid(x) = 0.5 * tanh(0.5 * x) + 0.5 : one EUP transcendental and
        # no full-precision divide on the VALU (v5e has no bf16 VPU/EUP, so
        # keep the math in f32 and cast back).
        xf = x.astype(jnp.float32)
        return (0.5 * jnp.tanh(0.5 * xf) + 0.5).astype(x.dtype)
    if act == "tanh":
        return jnp.tanh(x.astype(jnp.float32)).astype(x.dtype)
    raise ValueError(f"unsupported act_fn: {act!r} (supported: {_SUPPORTED_ACTS})")


def _activation_kernel(x_ref, o_ref, *, act: str):
    o_ref[...] = _apply_act(x_ref[...], act).astype(o_ref.dtype)


def _block_and_vmem_defaults():
    """Pick (target_block_bytes, vmem_limit_bytes) per TPU generation."""
    vmem = None
    try:
        vmem = getattr(pltpu.get_tpu_info(), "vmem_capacity_bytes", None)
    except Exception:  # pragma: no cover - conservative fallback
        vmem = None
    if vmem is not None and vmem < 96 * 1024 * 1024:
        # v7x: 64 MiB VMEM per TensorCore -> 4 MiB blocks (16 MiB resident
        # with 2x double buffering of in + out).
        return 4 * 1024 * 1024, 48 * 1024 * 1024
    # v5e / v6e: 128 MiB physical VMEM -> 8 MiB blocks (32 MiB resident).
    return 8 * 1024 * 1024, 48 * 1024 * 1024


def activation_warper(
    x: jax.Array,
    act: str = "relu",
    *,
    target_block_bytes: int | None = None,
    vmem_limit_bytes: int | None = None,
    donate: bool = False,
) -> jax.Array:
    """Elementwise activation on an arbitrarily-shaped array via a Pallas kernel."""
    if act not in _SUPPORTED_ACTS:
        raise ValueError(f"unsupported act_fn: {act!r} (supported: {_SUPPORTED_ACTS})")

    orig_shape = x.shape
    dtype = x.dtype
    total = x.size
    if total == 0:
        return x

    itemsize = jnp.dtype(dtype).itemsize

    # Pick the widest lane dim that divides `total` (no padding, wide unmasked
    # vst stores). If nothing divides, a Pallas wrapper would need a full-array
    # pad + slice (2 extra HBM round trips) -- cheaper to let XLA fuse plain jnp.
    lane = None
    for cand in _LANE_CANDIDATES:
        if total % cand == 0:
            lane = cand
            break
    if lane is None:
        return _apply_act(x, act).astype(dtype)

    rows = total // lane
    x2d = jnp.reshape(x, (rows, lane))

    # Sublane packing requirement: 8 rows for 4-byte, 16 for 2-byte, 32 for 1-byte.
    pack = max(8, 32 // itemsize)

    default_block, default_vmem = _block_and_vmem_defaults()
    if target_block_bytes is None:
        target_block_bytes = default_block
    if vmem_limit_bytes is None:
        vmem_limit_bytes = default_vmem

    tile_rows = (target_block_bytes // (lane * itemsize)) // pack * pack
    tile_rows = max(tile_rows, pack)
    if rows > pack:
        # Guarantee >= 2 grid steps so the "parallel" axis can shard across
        # v7x's 2 TensorCores instead of leaving half the chip's DMA idle.
        half = (pl.cdiv(rows, 2) // pack) * pack
        tile_rows = min(tile_rows, max(pack, half))
    tile_rows = min(tile_rows, rows)
    grid = (pl.cdiv(rows, tile_rows),)

    n_trans = 0 if act == "relu" else total
    cost = pl.CostEstimate(
        flops=total,
        transcendentals=n_trans,
        bytes_accessed=2 * total * itemsize,
    )

    out2d = pl.pallas_call(
        functools.partial(_activation_kernel, act=act),
        out_shape=jax.ShapeDtypeStruct((rows, lane), dtype),
        grid_spec=pltpu.PrefetchScalarGridSpec(
            num_scalar_prefetch=0,
            grid=grid,
            # If a profile shows exposed DMA gaps at these block sizes, sweep
            # pipeline_mode=pl.Buffered(3) on these specs (expected 0-5%).
            in_specs=[pl.BlockSpec((tile_rows, lane), lambda i: (i, 0))],
            out_specs=pl.BlockSpec((tile_rows, lane), lambda i: (i, 0)),
        ),
        compiler_params=pltpu.CompilerParams(
            dimension_semantics=("parallel",),
            vmem_limit_bytes=vmem_limit_bytes,
        ),
        cost_estimate=cost,
        input_output_aliases={0: 0} if donate else {},
    )(x2d)

    return out2d.reshape(orig_shape)


class ActivationWarper:
    """JAX/Pallas port of model/made.py::ActivationWarper.

    Takes the activation by name ("relu" / "sigmoid" / "tanh") rather than as a
    callable, matching what MADE actually passes.
    """

    def __init__(self, act_fn: str = "relu"):
        self.act_fn = act_fn

    def __call__(self, x: jax.Array) -> jax.Array:
        return activation_warper(x, self.act_fn)


if __name__ == "__main__":
    key = jax.random.PRNGKey(0)
    # NCHW example input: batch=2, channels=4, spatial=16x16.
    x = jax.random.normal(key, (2, 4, 16, 16), dtype=jnp.float32)
    ref = jnp.maximum(x, 0.0)

    warper = ActivationWarper("relu")
    y = jax.block_until_ready(warper(x))
    assert y.shape == x.shape and y.dtype == x.dtype
    assert jnp.array_equal(y, ref), "relu mismatch vs reference"

    # Donated variant: output may alias the input HBM buffer.
    y_d = jax.block_until_ready(activation_warper(x, "relu", donate=True))
    assert jnp.array_equal(y_d, ref), "relu (donate) mismatch vs reference"

    # Ragged element count (not a multiple of 128) -> fused jnp fallback path.
    x2 = jax.random.normal(jax.random.PRNGKey(1), (3, 5, 7), dtype=jnp.float32)
    y2 = jax.block_until_ready(activation_warper(x2, "tanh"))
    assert jnp.allclose(y2, jnp.tanh(x2), atol=1e-5, rtol=1e-5), "tanh mismatch"

    # Multi-step grid with a partial last block (tiny block target forces >1 step).
    x3 = jax.random.normal(jax.random.PRNGKey(2), (4, 3, 64, 64), dtype=jnp.float32)
    y3 = jax.block_until_ready(
        activation_warper(x3, "sigmoid", target_block_bytes=64 * 1024)
    )
    assert jnp.allclose(y3, jax.nn.sigmoid(x3), atol=1e-5, rtol=1e-5), "sigmoid mismatch"

    # bf16 path (exercises the f32-compute / bf16-store cast).
    x4 = jax.random.normal(jax.random.PRNGKey(3), (8, 32, 128), dtype=jnp.bfloat16)
    y4 = jax.block_until_ready(activation_warper(x4, "sigmoid"))
    assert jnp.allclose(
        y4.astype(jnp.float32), jax.nn.sigmoid(x4.astype(jnp.float32)),
        atol=2e-2, rtol=2e-2,
    ), "bf16 sigmoid mismatch"

    print("KERNEL_OK")
</pallas_src>

<mosaic_0001>
module attributes {stable_mosaic.version = 11 : i64} {
  func.func @_activation_kernel(%arg0: i32, %arg1: memref<1x2048xf32, #tpu.memory_space<vmem>>, %arg2: memref<1x2048xf32, #tpu.memory_space<vmem>>) attributes {dimension_semantics = [#tpu.dimension_semantics<parallel>], iteration_bounds = array<i64: 1>, scalar_prefetch = 0 : i64, scratch_operands = 0 : i64, tpu.core_type = #tpu.core_type<tc>, window_params = [{transform_indices = @transform_0, window_bounds = array<i64: 1, 2048>}, {transform_indices = @transform_1, window_bounds = array<i64: 1, 2048>}]} {
    %c0 = arith.constant 0 : index
    %c0_0 = arith.constant 0 : index
    %0 = vector.load %arg1[%c0, %c0_0] : memref<1x2048xf32, #tpu.memory_space<vmem>>, vector<1x2048xf32>
    %cst = arith.constant 0.000000e+00 : f32
    %1 = vector.broadcast %cst : f32 to vector<1x2048xf32>
    %2 = arith.maximumf %0, %1 : vector<1x2048xf32>
    %c0_1 = arith.constant 0 : index
    %c0_2 = arith.constant 0 : index
    %3 = vector.load %arg2[%c0_1, %c0_2] : memref<1x2048xf32, #tpu.memory_space<vmem>>, vector<1x2048xf32>
    tpu.vector_store %arg2[%c0_1, %c0_2], %2 {strides = array<i32>} : memref<1x2048xf32, #tpu.memory_space<vmem>>, vector<1x2048xf32>,
    return
  }
  func.func @transform_0(%arg0: i32) -> (i32, i32) {
    %c0_i32 = arith.constant 0 : i32
    %c0_i32_0 = arith.constant 0 : i32
    return %arg0, %c0_i32 : i32, i32
  }
  func.func @transform_1(%arg0: i32) -> (i32, i32) {
    %c0_i32 = arith.constant 0 : i32
    %c0_i32_0 = arith.constant 0 : i32
    return %arg0, %c0_i32 : i32, i32
  }
}

</mosaic_0001>

<bundles_post_ra>
// kernel: tpu_custom_call.1
= control target key start
LH: loop header
LB: loop body
LE: loop exit
PB: predicated region body
PF: predicated region fallthrough
CT: control target
= control target key end

     0   :  { %6 = vsyncpa [#allocation3], 0  ;;  %s128_s0 = inlined_call_operand.hbm [shape: f32[1,2048], index: 0, kind: input, shape index: {}]   ;;  %s129_s1 = inlined_call_operand.hbm [shape: f32[1,2048], index: 1, kind: output, shape index: {}]  }
   0x1   :  { %7 = vsyncpa [#allocation4], 0  ;;  %s92_s6 = smov [#allocation2]   ;;  %s44_s10 = scalar_lea.hbm %s128_s0, 256 }
   0x2   :  { %s14_s7 = sshll.u32 %s92_s6, 4  ;;  %p45_p0 = scmp.ne.s32.totalorder %s128_s0, %s44_s10  ;;  %s15_s7 = int_to_ptr.vmem [resolvable:$true] %s14_s7 }
   0x3   :  { %p48_p1 = scmp.lt.u32.totalorder %s44_s10, %s128_s0 }
   0x5   :  { %p50_p2 = pnand %p48_p1, %p45_p0 }
   0x7   :  { %53 = shalt.err (!%p50_p2)
}
   0x8   :  { %s54_s15 = scalar_lea.vmem %s15_s7, 256  ;;  %p59_p4 = scmp.lt.s32.totalorder %s15_s7, %s15_s7 }
   0x9   :  { %p55_p3 = scmp.ne.s32.totalorder %s15_s7, %s54_s15  ;;  %p60_p5 = scmp.lt.s32.totalorder %s54_s15, %s54_s15 }
   0xb   :  { %p61_p6 = por %p60_p5, %p59_p4 }
   0xd   :  { %p62_p7 = pnand %p61_p6, %p55_p3 }
   0xf   :  { %65 = shalt.err (!%p62_p7)
}
  0x10   :  { %17 = dma.hbm_to_vmem [thread:$0]  %s128_s0, 256, %s15_s7, [#allocation3]  }
  0x11   :  { %88 = dma.done.wait [#allocation3], 256  }
  0x12   :  { %89 = vsyncadd [#allocation3], 4294967040  ;;  %s93_s18 = smov [#allocation5]   ;;  %v21_v0 = vld [vmem:[#allocation2] sm:$0xff]  ;;  %v22_v1 = vld [vmem:[#allocation2 + $0x8] sm:$0xff] }
  0x13   :  { %s33_s19 = sshll.u32 %s93_s18, 4  ;;  %v23_v2 = vmax.f32 %v21_v0, 0.0  ;;  %v24_v3 = vmax.f32 %v22_v1, 0.0  ;;  %s34_s19 = int_to_ptr.vmem [resolvable:$true] %s33_s19 }
  0x14   :  { %s66_s20 = scalar_lea.vmem %s34_s19, 256  ;;  %p71_p9 = scmp.lt.s32.totalorder %s34_s19, %s34_s19 }
  0x15   :  { %25 = vst [vmem:[#allocation5] sm:$0xff] %v23_v2  ;;  %26 = vst [vmem:[#allocation5 + $0x8] sm:$0xff] %v24_v3  ;;  %p67_p8 = scmp.ne.s32.totalorder %s34_s19, %s66_s20  ;;  %p72_p10 = scmp.lt.s32.totalorder %s66_s20, %s66_s20 }
  0x17   :  { %p73_p11 = por %p72_p10, %p71_p9 }
  0x19   :  { %p74_p12 = pnand %p73_p11, %p67_p8 }
  0x1b   :  { %77 = shalt.err (!%p74_p12)
}
  0x1c   :  { %s78_s22 = scalar_lea.hbm %s129_s1, 256 }
  0x1d   :  { %p79_p13 = scmp.ne.s32.totalorder %s129_s1, %s78_s22  ;;  %p82_p0 = scmp.lt.u32.totalorder %s78_s22, %s129_s1 }
  0x1f   :  { %p84_p1 = pnand %p82_p0, %p79_p13 }
  0x21   :  { %87 = shalt.err (!%p84_p1)
}
  0x22   :  { %36 = dma.vmem_to_hbm [thread:$0]  %s34_s19, 256, %s129_s1, [#allocation4]  }
  0x23   :  { %90 = dma.done.wait [#allocation4], 256  }
  0x24   :  { %91 = vsyncadd [#allocation4], 4294967040 }
  0x25   :  { %40 = vsyncpa [#allocation3], 1 }
  0x26   :  { %41 = vsyncpa [#allocation4], 1 }

</bundles_post_ra>
